<compile_context>
chip_gen: v5e
topology: v5e:2x2
jax: 0.10.0
libtpu: 0.0.40
codegen_flags: <defaults>
</compile_context>

<pallas_src>
import functools

import jax
import jax.numpy as jnp
from jax.experimental import pallas as pl
from jax.experimental.pallas import tpu as pltpu


def _round_up(x, m):
    return (x + m - 1) // m * m


def attention_cell_kernel(feat_ref, state_ref, w_ref, out_ref, *,
                          H, E, off_vec, off_gate):
    B, T, I = feat_ref.shape

    feat = feat_ref[...]                        # (B, T, I)
    state = state_ref[...]                      # (B, 2H+E) = [h | c | onehot]
    h = state[:, 0:H]
    c = state[:, H:2 * H]
    onehot = state[:, 2 * H:2 * H + E]

    # ---- weight slab (one DMA), static 8-row-aligned slices -----------------
    w_att = w_ref[0:I + H, 0:H]                 # (I+H, H)  [wi2h.T ; wh2h.T]
    vec = w_ref[off_vec:off_vec + 8, :]         # aligned 8-row misc block
    bh2h = vec[0:1, 0:H]                        # (1, H)
    wscore = vec[1:2, 0:H]                      # (1, H)
    bias = vec[2:3, 0:4 * H]                    # (1, 4H)   bih + bhh
    w_gate = w_ref[off_gate:off_gate + I + E + H, 0:4 * H]   # (I+E+H, 4H)

    # ---- attention scores: ONE fused MXU matmul -----------------------------
    h_rep = jnp.broadcast_to(h[:, None, :], (B, T, H)).reshape(B * T, H)
    lhs = jnp.concatenate([feat.reshape(B * T, I), h_rep], axis=1)   # (B*T, I+H)
    proj = jnp.dot(lhs, w_att, preferred_element_type=jnp.float32)   # (B*T, H)
    act = jnp.tanh((proj + bh2h).reshape(B, T, H))                   # (B, T, H)

    # score (H -> 1): VPU multiply + lane reduce (no N=1 matmul)
    e = jnp.sum(act * wscore, axis=-1)                               # (B, T)

    # softmax over time (== torch softmax(dim=1) on (B, T, 1))
    e_max = jnp.max(e, axis=-1, keepdims=True)
    p = jnp.exp(e - e_max)
    alpha = p / jnp.sum(p, axis=-1, keepdims=True)                   # (B, T)

    # ---- context vector: VPU multiply + sublane reduce (no M=1 matmuls) -----
    context = jnp.sum(alpha[:, :, None] * feat, axis=1)              # (B, I)

    # ---- LSTM cell: ONE fused gate matmul ------------------------------------
    gate_lhs = jnp.concatenate([context, onehot, h], axis=1)         # (B, I+E+H)
    gates = jnp.dot(gate_lhs, w_gate,
                    preferred_element_type=jnp.float32) + bias       # (B, 4H)

    sig = jax.nn.sigmoid(gates)       # one EUP pass over all 4H lanes
    tnh = jnp.tanh(gates)             # one EUP pass over all 4H lanes
    i_g = sig[:, 0 * H:1 * H]
    f_g = sig[:, 1 * H:2 * H]
    g_g = tnh[:, 2 * H:3 * H]
    o_g = sig[:, 3 * H:4 * H]

    c_new = f_g * c + i_g * g_g
    h_new = o_g * jnp.tanh(c_new)

    # packed output slab: [h_new | c_new | alpha]
    out_ref[...] = jnp.concatenate([h_new, c_new, alpha], axis=1)    # (B, 2H+T)


@jax.jit
def attention_cell(feat, h, c, onehot, params):
    B, T, I = feat.shape
    H = h.shape[-1]
    E = onehot.shape[-1]

    # ---- weight packing (glue, plain JAX): one lane-(4H) slab ----------------
    w_att = jnp.concatenate([params["wi2h"].T, params["wh2h"].T], axis=0)   # (I+H, H)
    w_gate = jnp.concatenate([params["wih"].T, params["whh"].T], axis=0)    # (I+E+H, 4H)
    bias = params["bih"] + params["bhh"]                                    # (4H,)

    off_vec = _round_up(I + H, 8)          # bh2h / wscore / bias rows
    off_gate = off_vec + 8                 # fused gate weight, 8-row aligned
    n_rows = _round_up(off_gate + I + E + H, 8)
    lanes = 4 * H

    slab = jnp.zeros((n_rows, lanes), jnp.float32)
    slab = slab.at[0:I + H, 0:H].set(w_att)
    slab = slab.at[off_vec, 0:H].set(params["bh2h"])
    slab = slab.at[off_vec + 1, 0:H].set(params["wscore"][0])
    slab = slab.at[off_vec + 2, 0:lanes].set(bias)
    slab = slab.at[off_gate:off_gate + I + E + H, 0:lanes].set(w_gate)

    # packed state slab: [h | c | onehot]
    state = jnp.concatenate([h, c, onehot], axis=1)                         # (B, 2H+E)

    kernel = functools.partial(attention_cell_kernel, H=H, E=E,
                               off_vec=off_vec, off_gate=off_gate)
    vmem = pltpu.MemorySpace.VMEM
    out = pl.pallas_call(
        kernel,
        out_shape=jax.ShapeDtypeStruct((B, 2 * H + T), jnp.float32),
        in_specs=[pl.BlockSpec(memory_space=vmem)] * 3,
        out_specs=pl.BlockSpec(memory_space=vmem),
    )(feat, state, slab)

    h_new = out[:, 0:H]
    c_new = out[:, H:2 * H]
    alpha = out[:, 2 * H:2 * H + T][:, :, None]   # restore PyTorch (B, T, 1)
    return (h_new, c_new), alpha


def reference_forward(feat, h, c, onehot, params):
    """Pure-JAX reference mirroring the PyTorch module exactly."""
    H = h.shape[-1]
    feat_proj = feat @ params["wi2h"].T                                  # (B,T,H)
    h_proj = (h @ params["wh2h"].T + params["bh2h"])[:, None, :]         # (B,1,H)
    e = jnp.tanh(feat_proj + h_proj) @ params["wscore"].T                # (B,T,1)
    alpha = jax.nn.softmax(e, axis=1)
    context = jnp.sum(alpha * feat, axis=1)                              # (B,I)
    concat = jnp.concatenate([context, onehot], axis=1)
    gates = (concat @ params["wih"].T + params["bih"]
             + h @ params["whh"].T + params["bhh"])
    i_g = jax.nn.sigmoid(gates[:, 0 * H:1 * H])
    f_g = jax.nn.sigmoid(gates[:, 1 * H:2 * H])
    g_g = jnp.tanh(gates[:, 2 * H:3 * H])
    o_g = jax.nn.sigmoid(gates[:, 3 * H:4 * H])
    c_new = f_g * c + i_g * g_g
    h_new = o_g * jnp.tanh(c_new)
    return (h_new, c_new), alpha


if __name__ == "__main__":
    B, T = 2, 8
    INPUT_SIZE, HIDDEN_SIZE, NUM_EMB = 32, 32, 16

    key = jax.random.PRNGKey(0)
    keys = jax.random.split(key, 12)

    params = {
        "wi2h":   0.1 * jax.random.normal(keys[0], (HIDDEN_SIZE, INPUT_SIZE), jnp.float32),
        "wh2h":   0.1 * jax.random.normal(keys[1], (HIDDEN_SIZE, HIDDEN_SIZE), jnp.float32),
        "bh2h":   0.1 * jax.random.normal(keys[2], (HIDDEN_SIZE,), jnp.float32),
        "wscore": 0.1 * jax.random.normal(keys[3], (1, HIDDEN_SIZE), jnp.float32),
        "wih":    0.1 * jax.random.normal(keys[4], (4 * HIDDEN_SIZE, INPUT_SIZE + NUM_EMB), jnp.float32),
        "whh":    0.1 * jax.random.normal(keys[5], (4 * HIDDEN_SIZE, HIDDEN_SIZE), jnp.float32),
        "bih":    0.1 * jax.random.normal(keys[6], (4 * HIDDEN_SIZE,), jnp.float32),
        "bhh":    0.1 * jax.random.normal(keys[7], (4 * HIDDEN_SIZE,), jnp.float32),
    }

    feat_ct = jax.random.normal(keys[8], (B, T, INPUT_SIZE), jnp.float32)
    prev_h = jax.random.normal(keys[9], (B, HIDDEN_SIZE), jnp.float32)
    prev_c = jax.random.normal(keys[10], (B, HIDDEN_SIZE), jnp.float32)
    char_onehots = jax.nn.one_hot(
        jax.random.randint(keys[11], (B,), 0, NUM_EMB), NUM_EMB, dtype=jnp.float32)

    (h_new, c_new), alpha = attention_cell(feat_ct, prev_h, prev_c, char_onehots, params)
    jax.block_until_ready((h_new, c_new, alpha))

    (h_ref, c_ref), alpha_ref = reference_forward(feat_ct, prev_h, prev_c, char_onehots, params)
    assert jnp.allclose(h_new, h_ref, atol=1e-5, rtol=1e-5)
    assert jnp.allclose(c_new, c_ref, atol=1e-5, rtol=1e-5)
    assert jnp.allclose(alpha, alpha_ref, atol=1e-5, rtol=1e-5)

    print("KERNEL_OK")
</pallas_src>

<mosaic_0001>
module attributes {stable_mosaic.version = 11 : i64} {
  func.func @attention_cell_kernel(%arg0: memref<2x8x32xf32, #tpu.memory_space<vmem>>, %arg1: memref<2x80xf32, #tpu.memory_space<vmem>>, %arg2: memref<152x128xf32, #tpu.memory_space<vmem>>, %arg3: memref<2x72xf32, #tpu.memory_space<vmem>>) attributes {dimension_semantics = [], scalar_prefetch = 0 : i64, scratch_operands = 0 : i64, tpu.core_type = #tpu.core_type<tc>} {
    %c0 = arith.constant 0 : index
    %c0_0 = arith.constant 0 : index
    %c0_1 = arith.constant 0 : index
    %0 = vector.load %arg0[%c0, %c0_0, %c0_1] : memref<2x8x32xf32, #tpu.memory_space<vmem>>, vector<2x8x32xf32>
    %c0_2 = arith.constant 0 : index
    %c0_3 = arith.constant 0 : index
    %1 = vector.load %arg1[%c0_2, %c0_3] : memref<2x80xf32, #tpu.memory_space<vmem>>, vector<2x80xf32>
    %2 = vector.extract_strided_slice %1 {offsets = [0, 0], sizes = [2, 32], strides = [1, 1]} : vector<2x80xf32> to vector<2x32xf32>
    %3 = vector.extract_strided_slice %1 {offsets = [0, 32], sizes = [2, 32], strides = [1, 1]} : vector<2x80xf32> to vector<2x32xf32>
    %4 = vector.extract_strided_slice %1 {offsets = [0, 64], sizes = [2, 16], strides = [1, 1]} : vector<2x80xf32> to vector<2x16xf32>
    %c0_4 = arith.constant 0 : index
    %c0_5 = arith.constant 0 : index
    %5 = vector.load %arg2[%c0_4, %c0_5] : memref<152x128xf32, #tpu.memory_space<vmem>>, vector<64x32xf32>
    %c64 = arith.constant 64 : index
    %c0_6 = arith.constant 0 : index
    %6 = vector.load %arg2[%c64, %c0_6] : memref<152x128xf32, #tpu.memory_space<vmem>>, vector<8x128xf32>
    %7 = vector.extract_strided_slice %6 {offsets = [0, 0], sizes = [1, 32], strides = [1, 1]} : vector<8x128xf32> to vector<1x32xf32>
    %8 = vector.extract_strided_slice %6 {offsets = [1, 0], sizes = [1, 32], strides = [1, 1]} : vector<8x128xf32> to vector<1x32xf32>
    %9 = vector.extract_strided_slice %6 {offsets = [2, 0], sizes = [1, 128], strides = [1, 1]} : vector<8x128xf32> to vector<1x128xf32>
    %c72 = arith.constant 72 : index
    %c0_7 = arith.constant 0 : index
    %10 = vector.load %arg2[%c72, %c0_7] : memref<152x128xf32, #tpu.memory_space<vmem>>, vector<80x128xf32>
    %11 = vector.shape_cast %2 : vector<2x32xf32> to vector<2x1x32xf32>
    %12 = vector.shape_cast %11 : vector<2x1x32xf32> to vector<2x1x32xf32>
    %13 = vector.broadcast %12 : vector<2x1x32xf32> to vector<2x8x32xf32>
    %14 = vector.shape_cast %13 : vector<2x8x32xf32> to vector<16x32xf32>
    %15 = vector.shape_cast %0 : vector<2x8x32xf32> to vector<16x32xf32>
    %16 = tpu.concatenate %15, %14 in 1 : vector<16x32xf32>, vector<16x32xf32> -> vector<16x64xf32>
    %cst = arith.constant dense<0.000000e+00> : vector<16x32xf32>
    %17 = tpu.matmul %16, %5, %cst {dimension_numbers = #tpu.dot_dimension_numbers<[1], [0], [0], [1], [0, 0, 1, 1], [], []>} : vector<16x64xf32>, vector<64x32xf32>, vector<16x32xf32> -> vector<16x32xf32>
    %18 = vector.broadcast %7 : vector<1x32xf32> to vector<16x32xf32>
    %19 = arith.addf %17, %18 : vector<16x32xf32>
    %20 = vector.shape_cast %19 : vector<16x32xf32> to vector<2x8x32xf32>
    %21 = math.tanh %20 : vector<2x8x32xf32>
    %22 = vector.shape_cast %8 : vector<1x32xf32> to vector<1x1x32xf32>
    %23 = vector.broadcast %22 : vector<1x1x32xf32> to vector<2x8x32xf32>
    %24 = arith.mulf %21, %23 : vector<2x8x32xf32>
    %cst_8 = arith.constant dense<0.000000e+00> : vector<2x8xf32>
    %25 = vector.multi_reduction <add>, %24, %cst_8 [2] : vector<2x8x32xf32> to vector<2x8xf32>
    %cst_9 = arith.constant dense<0xFF800000> : vector<2xf32>
    %26 = vector.multi_reduction <maximumf>, %25, %cst_9 [1] : vector<2x8xf32> to vector<2xf32>
    %27 = vector.shape_cast %26 : vector<2xf32> to vector<2x1xf32>
    %28 = vector.broadcast %27 : vector<2x1xf32> to vector<2x8xf32>
    %29 = arith.subf %25, %28 : vector<2x8xf32>
    %30 = math.exp %29 : vector<2x8xf32>
    %cst_10 = arith.constant dense<0.000000e+00> : vector<2xf32>
    %31 = vector.multi_reduction <add>, %30, %cst_10 [1] : vector<2x8xf32> to vector<2xf32>
    %32 = vector.shape_cast %31 : vector<2xf32> to vector<2x1xf32>
    %33 = vector.broadcast %32 : vector<2x1xf32> to vector<2x8xf32>
    %34 = arith.divf %30, %33 : vector<2x8xf32>
    %35 = vector.shape_cast %34 : vector<2x8xf32> to vector<2x8x1xf32>
    %36 = vector.broadcast %35 : vector<2x8x1xf32> to vector<2x8x32xf32>
    %37 = arith.mulf %36, %0 : vector<2x8x32xf32>
    %cst_11 = arith.constant dense<0.000000e+00> : vector<2x32xf32>
    %38 = vector.multi_reduction <add>, %37, %cst_11 [1] : vector<2x8x32xf32> to vector<2x32xf32>
    %39 = tpu.concatenate %38, %4, %2 in 1 : vector<2x32xf32>, vector<2x16xf32>, vector<2x32xf32> -> vector<2x80xf32>
    %cst_12 = arith.constant dense<0.000000e+00> : vector<2x128xf32>
    %40 = tpu.matmul %39, %10, %cst_12 {dimension_numbers = #tpu.dot_dimension_numbers<[1], [0], [0], [1], [0, 0, 1, 1], [], []>} : vector<2x80xf32>, vector<80x128xf32>, vector<2x128xf32> -> vector<2x128xf32>
    %41 = vector.broadcast %9 : vector<1x128xf32> to vector<2x128xf32>
    %42 = arith.addf %40, %41 : vector<2x128xf32>
    %43 = arith.negf %42 : vector<2x128xf32>
    %44 = math.exp %43 : vector<2x128xf32>
    %cst_13 = arith.constant 1.000000e+00 : f32
    %45 = vector.broadcast %cst_13 : f32 to vector<2x128xf32>
    %46 = arith.addf %45, %44 : vector<2x128xf32>
    %47 = arith.divf %45, %46 : vector<2x128xf32>
    %48 = math.tanh %42 : vector<2x128xf32>
    %49 = vector.extract_strided_slice %47 {offsets = [0, 0], sizes = [2, 32], strides = [1, 1]} : vector<2x128xf32> to vector<2x32xf32>
    %50 = vector.extract_strided_slice %47 {offsets = [0, 32], sizes = [2, 32], strides = [1, 1]} : vector<2x128xf32> to vector<2x32xf32>
    %51 = vector.extract_strided_slice %48 {offsets = [0, 64], sizes = [2, 32], strides = [1, 1]} : vector<2x128xf32> to vector<2x32xf32>
    %52 = vector.extract_strided_slice %47 {offsets = [0, 96], sizes = [2, 32], strides = [1, 1]} : vector<2x128xf32> to vector<2x32xf32>
    %53 = arith.mulf %50, %3 : vector<2x32xf32>
    %54 = arith.mulf %49, %51 : vector<2x32xf32>
    %55 = arith.addf %53, %54 : vector<2x32xf32>
    %56 = math.tanh %55 : vector<2x32xf32>
    %57 = arith.mulf %52, %56 : vector<2x32xf32>
    %58 = tpu.concatenate %57, %55, %34 in 1 : vector<2x32xf32>, vector<2x32xf32>, vector<2x8xf32> -> vector<2x72xf32>
    %c0_14 = arith.constant 0 : index
    %c0_15 = arith.constant 0 : index
    %59 = vector.load %arg3[%c0_14, %c0_15] : memref<2x72xf32, #tpu.memory_space<vmem>>, vector<2x72xf32>
    tpu.vector_store %arg3[%c0_14, %c0_15], %58 {strides = array<i32>} : memref<2x72xf32, #tpu.memory_space<vmem>>, vector<2x72xf32>,
    return
  }
}

</mosaic_0001>

<bundles_post_ra>
// kernel: attention_cell.1
= control target key start
LH: loop header
LB: loop body
LE: loop exit
PB: predicated region body
PF: predicated region fallthrough
CT: control target
= control target key end

     0   :  { %s323_s21 = smov 32   ;;  %vm46_vm0 = vcmask 261120   ;;  %vm50_vm1 = vcmask 523264   ;;  %v93_v32 = vlaneseq  ;;  %vm97_vm2 = vcmask 1041409   ;;  %s326_s11 = smov 48   ;;  %s473_s1 = inlined_call_operand.vmem [shape: f32[2,80], index: 1, kind: input, shape index: {}]   ;;  %s474_s2 = inlined_call_operand.vmem [shape: f32[152,128], index: 2, kind: input, shape index: {}]   ;;  %s475_s0 = inlined_call_operand.vmem [shape: f32[2,8,32], index: 0, kind: input, shape index: {}]   ;;  %s476_s3 = inlined_call_operand.vmem [shape: f32[2,72], index: 3, kind: output, shape index: {}]  }
   0x1   :  { %v351_v0 = vld [vmem:[%s473_s1] sm:$0x3]  ;;  %v24_v1 = vld [vmem:[%s474_s2 + $0x38] sm:$0xff]  ;;  %v23_v2 = vld [vmem:[%s474_s2 + $0x30] sm:$0xff]  ;;  %vm100_vm3 = vcmask 58368   ;;  %v324_v39 = vmov 0  }
   0x2   :  { %v37_v3 = vrot.slane %v351_v0, 1  ;;  %287 = vmatpush.msra.mxu2 %v24_v1  ;;  %65 = vmatpush.msra.mxu0 %v24_v1  ;;  %v22_v4 = vld [vmem:[%s474_s2 + $0x28] sm:$0xff]  ;;  %v21_v6 = vld [vmem:[%s474_s2 + $0x20] sm:$0xff]  ;;  %v20_v7 = vld [vmem:[%s474_s2 + $0x18] sm:$0xff]  ;;  %v38_v9 = vperm.slane %v351_v0, 0  ;;  %v406_v33 = vand.u32 127, %v93_v32 }
   0x3   :  { %v19_v8 = vld [vmem:[%s474_s2 + $0x10] sm:$0xff]  ;;  %v18_v10 = vld [vmem:[%s474_s2 + $0x8] sm:$0xff]  ;;  %v17_v11 = vld [vmem:[%s474_s2] sm:$0xff]  ;;  %301 = vset.pattern.permute.xlu0 %v324_v39  ;;  %300 = vset.pattern.permute.xlu2 %v324_v39  ;;  %vm202_vm12 = vcmask 392192   ;;  %vm205_vm13 = vcmask 654336  }
   0x4   :  { %v39_v5 = vperm.slane %v37_v3, 0  ;;  %288 = vmatpush.msra.mxu2 %v23_v2  ;;  %66 = vmatpush.msra.mxu0 %v23_v2  ;;  %v384_v12 = vld [vmem:[%s475_s0 + $0x8] sm:$0xff]  ;;  %v392_v15 = vld [vmem:[%s475_s0] sm:$0xff]  ;;  %s325_s0 = smov 96   ;;  %v35_v55 = vld [vmem:[%s474_s2 + $0x90] sm:$0xff] }
   0x5   :  { %v400_v18 = vld [vmem:[%s474_s2 + $0x40] sm:$0xff]  ;;  %302 = vset.pattern.permute.xlu1 %v324_v39  ;;  %215 = vmatpush.msra.mxu1 %v35_v55 }
   0x6   :  { %42 = vrot.lane.b32.xlu0 %v39_v5, %s323_s21  ;;  %289 = vmatpush.msra.mxu2 %v22_v4  ;;  %v49_v19 = vperm.slane %v400_v18, 0  ;;  %v82_v24 = vperm.slane %v400_v18, 1 }
   0x7   :  { %67 = vmatpush.msra.mxu0 %v22_v4 }
   0x8   :  { %290 = vmatpush.msra.mxu2 %v21_v6 }
   0x9   :  { %68 = vmatpush.msra.mxu0 %v21_v6 }
   0xa   :  { %291 = vmatpush.msra.mxu2 %v20_v7 }
   0xb   :  { %69 = vmatpush.msra.mxu0 %v20_v7 }
   0xc   :  { %292 = vmatpush.msra.mxu2 %v19_v8 }
   0xd   :  { %70 = vmatpush.msra.mxu0 %v19_v8 }
   0xe   :  { %40 = vrot.lane.b32.xlu0 %v38_v9, %s323_s21  ;;  %293 = vmatpush.msra.mxu2 %v18_v10 }
   0xf   :  { %71 = vmatpush.msra.mxu0 %v18_v10 }
  0x10   :  { %294 = vmatpush.msra.mxu2 %v17_v11 }
  0x11   :  { %72 = vmatpush.msra.mxu0 %v17_v11 }
  0x78   :  { %v43_v13 = vpop.permute.xlu0 %42 }
  0x79   :  { %v48_v14 = vsel %vm46_vm0, %v384_v12, %v43_v13 }
  0x7a   :  { %284 = vmatmul.msk.f32.vlgmr.msra.gmra.mxu2 %vm50_vm1, %v48_v14 }
  0x80   :  { %v41_v16 = vpop.permute.xlu0 %40 }
  0x81   :  { %v47_v17 = vsel %vm46_vm0, %v392_v15, %v41_v16 }
  0x82   :  { %283 = vmatmul.msk.f32.vlgmr.msra.gmra.mxu0 %vm50_vm1, %v47_v17 }
  0xfd   :  { %v77_v20 = vpop.f32.mrf.mxu2 }
  0xfe   :  { %v78_v23 = vadd.f32 %v77_v20, %v49_v19 }
  0xff   :  { %v74_v21 = vpop.f32.mrf.mxu0 }
 0x100   :  { %v75_v22 = vadd.f32 %v74_v21, %v49_v19  ;;  %v34_v21 = vld [vmem:[%s474_s2 + $0x88] sm:$0xff] }
 0x101   :  { %216 = vmatpush.msra.mxu1 %v34_v21 }
 0x102   :  { %303 = vtanh.f32 %v75_v22  ;;  %v33_v22 = vld [vmem:[%s474_s2 + $0x80] sm:$0xff] }
 0x103   :  { %305 = vtanh.f32 %v78_v23  ;;  %217 = vmatpush.msra.mxu1 %v33_v22  ;;  %v32_v23 = vld [vmem:[%s474_s2 + $0x78] sm:$0xff] }
 0x105   :  { %218 = vmatpush.msra.mxu1 %v32_v23 }
 0x108   :  { %v304_v25 = vpop.eup %303 }
 0x109   :  { %v83_v26 = vmul.f32 %v304_v25, %v82_v24  ;;  %v306_v28 = vpop.eup %305  ;;  %v30_v25 = vld [vmem:[%s474_s2 + $0x68] sm:$0xff] }
 0x10a   :  { %v84_v29 = vmul.f32 %v306_v28, %v82_v24  ;;  %v31_v24 = vld [vmem:[%s474_s2 + $0x70] sm:$0xff] }
 0x10b   :  { %v85_v27 = vsel %vm46_vm0, %v83_v26, 0.0  ;;  %219 = vmatpush.msra.mxu1 %v31_v24  ;;  %v29_v26 = vld [vmem:[%s474_s2 + $0x60] sm:$0xff]  ;;  %v27_v28 = vld [vmem:[%s474_s2 + $0x50] sm:$0xff] }
 0x10c   :  { %86 = vadd.xlane.f32.xlu1 %v85_v27  ;;  %v88_v30 = vsel %vm46_vm0, %v84_v29, 0.0  ;;  %v28_v27 = vld [vmem:[%s474_s2 + $0x58] sm:$0xff]  ;;  %v26_v29 = vld [vmem:[%s474_s2 + $0x48] sm:$0xff]  ;;  %s327_s2 = smov 64  }
 0x10d   :  { %220 = vmatpush.msra.mxu1 %v30_v25 }
 0x10f   :  { %221 = vmatpush.msra.mxu1 %v29_v26 }
 0x111   :  { %222 = vmatpush.msra.mxu1 %v28_v27 }
 0x113   :  { %223 = vmatpush.msra.mxu1 %v27_v28 }
 0x114   :  { %89 = vadd.xlane.f32.xlu1 %v88_v30 }
 0x115   :  { %224 = vmatpush.msra.mxu1 %v26_v29 }
 0x17f   :  { %v87_v31 = vpop.xlane.xlu1 %86 }
 0x180   :  { %v95_v35 = vperm.slane %v87_v31, %v406_v33 }
 0x187   :  { %v90_v34 = vpop.xlane.xlu1 %89 }
 0x188   :  { %v96_v36 = vperm.slane %v90_v34, %v406_v33 }
 0x18a   :  { %v98_v37 = vsel %vm97_vm2, %v96_v36, %v95_v35 }
 0x18b   :  { %v101_v38 = vsel %vm100_vm3, %v98_v37, -inf }
 0x18c   :  { %102 = vmax.xlane.f32.xlu2 %v101_v38 }
 0x1ff   :  { %v103_v40 = vpop.xlane.xlu2 %102 }
 0x200   :  { %v105_v41 = vperm.slane %v103_v40, 0  ;;  %v106_v42 = vperm.slane %v103_v40, 1 }
 0x202   :  { %v109_v43 = vsub.f32 %v87_v31, %v105_v41  ;;  %v110_v44 = vsub.f32 %v90_v34, %v106_v42 }
 0x204   :  { %v111_v45 = vmul.f32 1.442695, %v109_v43  ;;  %v113_v46 = vmul.f32 1.442695, %v110_v44 }
 0x206   :  { %307 = vpow2.f32 %v111_v45 }
 0x207   :  { %309 = vpow2.f32 %v113_v46 }
 0x20c   :  { %v308_v47 = vpop.eup %307 }
 0x20d   :  { %v310_v48 = vpop.eup %309  ;;  %118 = vperm.xlu2 %300, %v308_v47  }
 0x20e   :  { %121 = vperm.xlu0 %301, %v310_v48  }
 0x215   :  { %195 = vrot.lane.b32.xlu2 %v351_v0, %s325_s0 }
 0x267   :  { %v119_v49 = vpop.permute.xlu2 %118 }
 0x268   :  { %v123_v51 = vperm.slane %v119_v49, %v406_v33 }
 0x280   :  { %v122_v50 = vpop.permute.xlu0 %121 }
 0x281   :  { %v124_v52 = vperm.slane %v122_v50, %v406_v33 }
 0x283   :  { %v125_v53 = vsel %vm97_vm2, %v124_v52, %v123_v51  ;;  %v204_v52 = vperm.slane %v400_v18, 2 }
 0x284   :  { %v127_v54 = vsel %vm100_vm3, %v125_v53, 0.0 }
 0x285   :  { %128 = vadd.xlane.f32.xlu1 %v127_v54 }
 0x2f8   :  { %v129_v56 = vpop.xlane.xlu1 %128 }
 0x2f9   :  { %v131_v57 = vperm.slane %v129_v56, 0  ;;  %v132_v58 = vperm.slane %v129_v56, 1 }
 0x2fb   :  { %311 = vrcp.f32 %v131_v57  ;;  %v146_v2 = vand.u32 2147483648, %v131_v57  ;;  %v161_v3 = vand.u32 2147483648, %v132_v58  ;;  %v144_v5 = vand.u32 2147483647, %v131_v57 }
 0x2fc   :  { %313 = vrcp.f32 %v132_v58  ;;  %v159_v7 = vand.u32 2147483647, %v132_v58  ;;  %vm140_vm6 = vweird.f32 %v131_v57  ;;  %vm155_vm7 = vweird.f32 %v132_v58 }
 0x2fd   :  { %v147_v10 = vor.u32 1.1754944e-38, %v146_v2  ;;  %v162_v11 = vor.u32 1.1754944e-38, %v161_v3  ;;  %vm145_vm10 = vcmp.eq.f32.partialorder %v144_v5, 8.507059e+37 }
 0x2fe   :  { %vm160_vm11 = vcmp.eq.f32.partialorder %v159_v7, 8.507059e+37 }
 0x301   :  { %v312_v59 = vpop.eup %311 }
 0x302   :  { %v314_v60 = vpop.eup %313  ;;  %v136_v61 = vmul.f32 %v312_v59, %v131_v57  ;;  %vm141_vm4 = vweird.f32 %v312_v59 }
 0x303   :  { %v151_v62 = vmul.f32 %v314_v60, %v132_v58  ;;  %vm156_vm5 = vweird.f32 %v314_v60  ;;  %vm142_vm8 = vmor %vm140_vm6, %vm141_vm4 }
 0x304   :  { %v137_v63 = vsub.f32 1.0, %v136_v61  ;;  %vm157_vm9 = vmor %vm155_vm7, %vm156_vm5  ;;  %vm277_vm5 = vcmask 582656  }
 0x305   :  { %v152_v1 = vsub.f32 1.0, %v151_v62 }
 0x306   :  { %v138_v4 = vmul.f32 %v312_v59, %v137_v63 }
 0x307   :  { %v153_v6 = vmul.f32 %v314_v60, %v152_v1 }
 0x308   :  { %v139_v8 = vadd.f32 %v312_v59, %v138_v4 }
 0x309   :  { %v154_v9 = vadd.f32 %v314_v60, %v153_v6 }
 0x30a   :  { %v143_v13 = vsel %vm142_vm8, %v312_v59, %v139_v8 }
 0x30b   :  { %v158_v14 = vsel %vm157_vm9, %v314_v60, %v154_v9  ;;  %v148_v16 = vsel %vm145_vm10, %v147_v10, %v143_v13 }
 0x30c   :  { %v163_v17 = vsel %vm160_vm11, %v162_v11, %v158_v14  ;;  %v149_v19 = vmul.f32 %v308_v47, %v148_v16  ;;  %v270_v14 = vadd.s32 4294967232, %v406_v33 }
 0x30d   :  { %v164_v20 = vmul.f32 %v310_v48, %v163_v17 }
 0x30e   :  { %167 = vperm.xlu1 %302, %v149_v19  }
 0x30f   :  { %172 = vperm.xlu0 %301, %v164_v20  }
 0x317   :  { %198 = vrot.lane.b32.xlu0 %v351_v0, %s326_s11 }
 0x380   :  { %v448_v30 = vpop.permute.xlu1 %167 }
 0x381   :  { %v450_v31 = vpop.permute.xlu0 %172  ;;  %v175_v32 = vmul.f32 %v448_v30, %v392_v15  ;;  %v196_v15 = vpop.permute.xlu2 %195  ;;  %v271_v17 = vperm.slane %v448_v30, %v270_v14 }
 0x382   :  { %v176_v34 = vmul.f32 %v450_v31, %v384_v12  ;;  %v272_v16 = vperm.slane %v450_v31, %v270_v14 }
 0x383   :  { %v177_v35 = vsel %vm46_vm0, %v175_v32, 0.0 }
 0x384   :  { %v184_v36 = vsel %vm46_vm0, %v176_v34, 0.0  ;;  %v178_v37 = vrot.slane %v177_v35, 4  ;;  %v273_v20 = vsel %vm97_vm2, %v272_v16, %v271_v17 }
 0x385   :  { %v185_v38 = vrot.slane %v184_v36, 4 }
 0x386   :  { %v179_v39 = vadd.f32 %v178_v37, %v177_v35 }
 0x387   :  { %v186_v40 = vadd.f32 %v185_v38, %v184_v36 }
 0x388   :  { %v180_v41 = vrot.slane %v179_v39, 2 }
 0x389   :  { %v187_v42 = vrot.slane %v186_v40, 2  ;;  %v199_v49 = vpop.permute.xlu0 %198 }
 0x38a   :  { %v181_v43 = vadd.f32 %v180_v41, %v179_v39 }
 0x38b   :  { %v188_v44 = vadd.f32 %v187_v42, %v186_v40 }
 0x38c   :  { %v182_v45 = vrot.slane %v181_v43, 1 }
 0x38d   :  { %v189_v46 = vrot.slane %v188_v44, 1 }
 0x38e   :  { %v183_v47 = vadd.f32 %v182_v45, %v181_v43 }
 0x38f   :  { %v190_v48 = vadd.f32 %v189_v46, %v188_v44 }
 0x391   :  { %v193_v12 = vsel %vm97_vm2, %v190_v48, %v183_v47 }
 0x392   :  { %v201_v50 = vsel %vm46_vm0, %v193_v12, %v196_v15 }
 0x393   :  { %v203_v51 = vsel %vm202_vm12, %v201_v50, %v199_v49 }
 0x394   :  { %285 = vmatmul.msk.f32.vlgmr.msra.gmra.mxu1 %vm205_vm13, %v203_v51 }
 0x411   :  { %v226_v53 = vpop.f32.mrf.mxu1 }
 0x412   :  { %v227_v54 = vadd.f32 %v226_v53, %v204_v52 }
 0x414   :  { %315 = vtanh.f32 %v227_v54  ;;  %v286_v56 = vmul.f32 -1.442695, %v227_v54 }
 0x416   :  { %317 = vpow2.f32 %v286_v56 }
 0x41a   :  { %v316_v55 = vpop.eup %315 }
 0x41b   :  { %251 = vrot.lane.b32.xlu2 %v316_v55, %s327_s2 }
 0x41c   :  { %v318_v57 = vpop.eup %317 }
 0x41d   :  { %v232_v58 = vadd.f32 1.0, %v318_v57 }
 0x41f   :  { %319 = vrcp.f32 %v232_v58  ;;  %v244_v1 = vand.u32 2147483648, %v232_v58  ;;  %vm238_vm15 = vweird.f32 %v232_v58  ;;  %v242_v18 = vand.u32 2147483647, %v232_v58 }
 0x421   :  { %v245_v3 = vor.u32 1.1754944e-38, %v244_v1  ;;  %vm243_vm4 = vcmp.eq.f32.partialorder %v242_v18, 8.507059e+37 }
 0x425   :  { %v320_v59 = vpop.eup %319 }
 0x426   :  { %v234_v60 = vmul.f32 %v320_v59, %v232_v58  ;;  %vm239_vm14 = vweird.f32 %v320_v59 }
 0x427   :  { %vm240_vm3 = vmor %vm238_vm15, %vm239_vm14 }
 0x428   :  { %v235_v61 = vsub.f32 1.0, %v234_v60 }
 0x42a   :  { %v236_v62 = vmul.f32 %v320_v59, %v235_v61 }
 0x42c   :  { %v237_v63 = vadd.f32 %v320_v59, %v236_v62 }
 0x42e   :  { %v241_v2 = vsel %vm240_vm3, %v320_v59, %v237_v63 }
 0x42f   :  { %v246_v5 = vsel %vm243_vm4, %v245_v3, %v241_v2 }
 0x430   :  { %v249_v7 = vmul.f32 %v246_v5, %v351_v0 }
 0x475   :  { %v252_v4 = vpop.permute.xlu2 %251 }
 0x476   :  { %v254_v6 = vmul.f32 %v252_v4, %v246_v5 }
 0x478   :  { %256 = vrot.lane.b32.xlu0 %v254_v6, %s323_s21 }
 0x4ea   :  { %v257_v8 = vpop.permute.xlu0 %256 }
 0x4eb   :  { %v259_v9 = vadd.f32 %v257_v8, %v249_v7 }
 0x4ed   :  { %321 = vtanh.f32 %v259_v9 }
 0x4f3   :  { %v322_v10 = vpop.eup %321 }
 0x4f4   :  { %262 = vrot.lane.b32.xlu2 %v322_v10, %s327_s2 }
 0x54e   :  { %v263_v11 = vpop.permute.xlu2 %262 }
 0x54f   :  { %v265_v13 = vmul.f32 %v263_v11, %v246_v5 }
 0x551   :  { %267 = vrot.lane.b32.xlu1 %v265_v13, %s323_s21 }
 0x5c3   :  { %v268_v19 = vpop.permute.xlu1 %267 }
 0x5c4   :  { %v275_v0 = vsel %vm46_vm0, %v268_v19, %v259_v9 }
 0x5c5   :  { %v276_v21 = vsel %vm50_vm1, %v275_v0, %v273_v20 }
 0x5c6   :  { %278 = vst.msk [vmem:[%s476_s3] sm:$0x3] %vm277_vm5, %v276_v21 }

</bundles_post_ra>
